<compile_context>
chip_gen: v7x
topology: tpu7x:2x2x1
jax: 0.10.0
libtpu: 0.0.40
codegen_flags: <defaults>
</compile_context>

<pallas_src>
import functools
import math

import jax
import jax.numpy as jnp
from jax.experimental import pallas as pl
from jax.experimental.pallas import tpu as pltpu


def _glu_layer(h, w, gb, *, vbs, d_out, eps):
    """Linear -> GhostBN (per-virtual-batch stats) -> GLU on an f32 row tile."""
    rows = h.shape[0]
    n_vb = rows // vbs
    # Single wide matmul over both halves (better MXU lane occupancy).
    z = jnp.dot(h, w, preferred_element_type=jnp.float32)
    # Ghost batch norm: one-pass (sum / sum-of-squares) biased variance per
    # virtual batch of `vbs` rows, computed in f32.
    zr = z.reshape(n_vb, vbs, 2 * d_out)
    inv_n = 1.0 / vbs
    mean = jnp.sum(zr, axis=1, keepdims=True) * inv_n
    mean_sq = jnp.sum(zr * zr, axis=1, keepdims=True) * inv_n
    var = mean_sq - mean * mean
    zn = ((zr - mean) * jax.lax.rsqrt(var + eps)).reshape(rows, 2 * d_out)
    zn = zn * gb[0:1, :] + gb[1:2, :]          # affine gamma / beta
    # GLU gate. TODO(synk): for deployed configs with output_dim < 128 the
    # val/gate halves (and the stored output) are sub-128 lanes; padding the
    # lane dim to 128 in the wrapper would make these slices/stores lane-dense.
    return zn[:, :d_out] * jax.nn.sigmoid(zn[:, d_out:])


def _feat_transformer_kernel(*refs, n_rest, vbs, d_out, eps, scale):
    """Whole GLU-layer chain on one resident activation row tile."""
    if n_rest:
        x_ref, w0_ref, gb0_ref, wstack_ref, gbstack_ref, out_ref = refs
    else:
        x_ref, w0_ref, gb0_ref, out_ref = refs

    h = x_ref[...].astype(jnp.float32)
    # First GLU layer: no residual.
    h = _glu_layer(h, w0_ref[...].astype(jnp.float32),
                   gb0_ref[...].astype(jnp.float32),
                   vbs=vbs, d_out=d_out, eps=eps)
    # Remaining (equal-width) layers: h = (h + GLU(h)) * sqrt(0.5).
    # Static unroll keeps the whole chain visible to the scheduler; all weights
    # are already VMEM-resident (constant index_map).
    for l in range(n_rest):
        y = _glu_layer(h, wstack_ref[l].astype(jnp.float32),
                       gbstack_ref[l].astype(jnp.float32),
                       vbs=vbs, d_out=d_out, eps=eps)
        h = (h + y) * scale
    out_ref[...] = h.astype(out_ref.dtype)


def _choose_rows_per_tile(batch, vbs, d_in, d_out, io_itemsize,
                          tile_budget_bytes=32 * 1024 * 1024):
    """Rows per grid step: as large as VMEM comfortably allows (cap 2048 rows),
    an exact multiple of the virtual batch size, evenly dividing the batch, and
    preferably yielding >= 2 grid steps so v7x can use both TensorCores."""
    n_vb_total = batch // vbs
    # Per-row VMEM: double-buffered x & out tiles + f32 intermediates the
    # kernel materializes per layer (z, normalized z, h, glu output).
    per_row = (2 * d_in * io_itemsize + 2 * d_out * io_itemsize
               + 4 * (2 * d_out) * 4 + 2 * d_out * 4)
    max_rows_vmem = max(tile_budget_bytes // max(per_row, 1), vbs)
    target_rows = min(batch, 2048, max_rows_vmem)
    k = max(target_rows // vbs, 1)
    while n_vb_total % k:
        k -= 1
    if k == n_vb_total and n_vb_total >= 2:
        # Split into >= 2 row tiles so the "parallel" grid axis can be sharded
        # across v7x's two TensorCores (harmless on v5e/v6e).
        for cand in range(n_vb_total // 2, 0, -1):
            if n_vb_total % cand == 0:
                k = cand
                break
    rows = k * vbs
    # (8, 128) layout rule: the row tile must be a multiple of 8 sublanes
    # unless it spans the whole batch.
    if rows % 8 != 0 and rows != batch:
        rows = batch
    return rows


def feat_transformer(x, shared_params, specific_params, *, output_dim,
                     virtual_batch_size=128, eps=1e-5):
    """FeatTransformer.forward (training-mode ghost batch norm).

    shared_params / specific_params: lists of dicts with keys
      'w'     : (d_in, 2*output_dim)  Linear weight (bias=False), pre-transposed
      'gamma' : (2*output_dim,)       BN weight
      'beta'  : (2*output_dim,)       BN bias
    Shared block runs first (first=True); independent block follows.
    """
    layers = list(shared_params) + list(specific_params)
    if not layers:                      # both blocks are Identity
        return x

    batch, d_in = x.shape
    d_out = int(output_dim)
    vbs = min(int(virtual_batch_size), batch)
    # TODO(synk): torch.chunk allows a ragged last virtual batch; here the
    # batch must divide evenly into virtual batches (fails loudly otherwise).
    assert batch % vbs == 0, "batch must be a multiple of the virtual batch size"

    n_rest = len(layers) - 1
    w0 = jnp.asarray(layers[0]["w"])
    assert w0.shape == (d_in, 2 * d_out)
    gb0 = jnp.stack([jnp.asarray(layers[0]["gamma"]),
                     jnp.asarray(layers[0]["beta"])], axis=0)      # (2, 2*d_out)

    itemsize = jnp.dtype(x.dtype).itemsize
    rows = _choose_rows_per_tile(batch, vbs, d_in, d_out, itemsize)
    num_tiles = batch // rows

    in_specs = [
        pl.BlockSpec((rows, d_in), lambda i: (i, 0)),          # streamed x tile
        pl.BlockSpec((d_in, 2 * d_out), lambda i: (0, 0)),     # resident weights
        pl.BlockSpec((2, 2 * d_out), lambda i: (0, 0)),        # gamma/beta packed
    ]
    args = [x, w0, gb0]

    weight_elems = w0.size + gb0.size
    flops = 2 * batch * d_in * (2 * d_out)
    if n_rest:
        wstack = jnp.stack([jnp.asarray(p["w"]) for p in layers[1:]], axis=0)
        assert wstack.shape == (n_rest, d_out, 2 * d_out)
        gbstack = jnp.stack(
            [jnp.stack([jnp.asarray(p["gamma"]), jnp.asarray(p["beta"])], axis=0)
             for p in layers[1:]], axis=0)                      # (n_rest, 2, 2*d_out)
        in_specs += [
            pl.BlockSpec((n_rest, d_out, 2 * d_out), lambda i: (0, 0, 0)),
            pl.BlockSpec((n_rest, 2, 2 * d_out), lambda i: (0, 0, 0)),
        ]
        args += [wstack, gbstack]
        weight_elems += wstack.size + gbstack.size
        flops += n_rest * 2 * batch * d_out * (2 * d_out)

    n_layers = 1 + n_rest
    flops += n_layers * 12 * batch * d_out
    cost = pl.CostEstimate(
        flops=int(flops),
        transcendentals=int(n_layers * batch * 3 * d_out),     # sigmoid + rsqrt
        bytes_accessed=int((x.size + batch * d_out + weight_elems) * itemsize),
    )

    kernel = functools.partial(
        _feat_transformer_kernel,
        n_rest=n_rest, vbs=vbs, d_out=d_out,
        eps=float(eps), scale=float(math.sqrt(0.5)),
    )

    return pl.pallas_call(
        kernel,
        out_shape=jax.ShapeDtypeStruct((batch, d_out), x.dtype),
        grid=(num_tiles,),
        in_specs=in_specs,
        out_specs=pl.BlockSpec((rows, d_out), lambda i: (i, 0)),
        compiler_params=pltpu.CompilerParams(
            dimension_semantics=("parallel",),
            vmem_limit_bytes=48 * 1024 * 1024,
        ),
        cost_estimate=cost,
    )(*args)


# ------------------------- pure-JAX reference ------------------------------

def _ref_glu_layer(x, w, gamma, beta, d_out, vbs, eps):
    z = x @ w
    outs = []
    for c in range(x.shape[0] // vbs):
        zc = z[c * vbs:(c + 1) * vbs]
        m = zc.mean(axis=0, keepdims=True)
        v = jnp.mean((zc - m) ** 2, axis=0, keepdims=True)
        outs.append((zc - m) / jnp.sqrt(v + eps) * gamma + beta)
    zn = jnp.concatenate(outs, axis=0)
    return zn[:, :d_out] * jax.nn.sigmoid(zn[:, d_out:])


def _ref_feat_transformer(x, shared_params, specific_params, d_out, vbs, eps):
    s = math.sqrt(0.5)
    layers = list(shared_params) + list(specific_params)
    h = x
    for idx, p in enumerate(layers):
        y = _ref_glu_layer(h, p["w"], p["gamma"], p["beta"], d_out, vbs, eps)
        h = y if idx == 0 else (h + y) * s
    return h


if __name__ == "__main__":
    key = jax.random.PRNGKey(0)
    batch, input_dim, output_dim = 32, 32, 16
    virtual_batch_size = 8
    n_shared, n_independent = 2, 2

    def make_layer(k, d_in, d_out):
        kw, kg, kb = jax.random.split(k, 3)
        # xavier_normal_ with TabNet's gain
        gain = math.sqrt((d_in + 2 * d_out) / math.sqrt(d_in))
        std = gain * math.sqrt(2.0 / (d_in + 2 * d_out))
        w = std * jax.random.normal(kw, (d_in, 2 * d_out), jnp.float32)
        gamma = 1.0 + 0.1 * jax.random.normal(kg, (2 * d_out,), jnp.float32)
        beta = 0.1 * jax.random.normal(kb, (2 * d_out,), jnp.float32)
        return {"w": w, "gamma": gamma, "beta": beta}

    keys = jax.random.split(key, 1 + n_shared + n_independent)
    x = jax.random.normal(keys[0], (batch, input_dim), jnp.float32)

    shared_params = []
    d_in = input_dim
    for i in range(n_shared):
        shared_params.append(make_layer(keys[1 + i], d_in, output_dim))
        d_in = output_dim
    specific_params = [
        make_layer(keys[1 + n_shared + i], output_dim, output_dim)
        for i in range(n_independent)
    ]

    out = feat_transformer(
        x, shared_params, specific_params,
        output_dim=output_dim, virtual_batch_size=virtual_batch_size)
    out = jax.block_until_ready(out)

    ref = _ref_feat_transformer(
        x, shared_params, specific_params, output_dim, virtual_batch_size, 1e-5)

    assert out.shape == (batch, output_dim)
    assert bool(jnp.all(jnp.isfinite(out)))
    max_diff = float(jnp.max(jnp.abs(out - ref)))
    assert bool(jnp.allclose(out, ref, atol=2e-3, rtol=2e-3)), \
        f"max abs diff vs reference: {max_diff}"

    print("KERNEL_OK")
</pallas_src>

<mosaic_0001>
module attributes {stable_mosaic.version = 11 : i64} {
  func.func @_feat_transformer_kernel(%arg0: i32, %arg1: memref<16x32xf32, #tpu.memory_space<vmem>>, %arg2: memref<32x32xf32, #tpu.memory_space<vmem>>, %arg3: memref<2x32xf32, #tpu.memory_space<vmem>>, %arg4: memref<3x16x32xf32, #tpu.memory_space<vmem>>, %arg5: memref<3x2x32xf32, #tpu.memory_space<vmem>>, %arg6: memref<16x16xf32, #tpu.memory_space<vmem>>) attributes {dimension_semantics = [#tpu.dimension_semantics<parallel>], iteration_bounds = array<i64: 2>, scalar_prefetch = 0 : i64, scratch_operands = 0 : i64, tpu.core_type = #tpu.core_type<tc>, window_params = [{transform_indices = @transform_0, window_bounds = array<i64: 16, 32>}, {pipeline_mode = #tpu.pipeline_mode<synchronous>, transform_indices = @transform_1, window_bounds = array<i64: 32, 32>}, {pipeline_mode = #tpu.pipeline_mode<synchronous>, transform_indices = @transform_2, window_bounds = array<i64: 2, 32>}, {pipeline_mode = #tpu.pipeline_mode<synchronous>, transform_indices = @transform_3, window_bounds = array<i64: 3, 16, 32>}, {pipeline_mode = #tpu.pipeline_mode<synchronous>, transform_indices = @transform_4, window_bounds = array<i64: 3, 2, 32>}, {transform_indices = @transform_5, window_bounds = array<i64: 16, 16>}]} {
    %c0 = arith.constant 0 : index
    %c0_0 = arith.constant 0 : index
    %0 = vector.load %arg1[%c0, %c0_0] : memref<16x32xf32, #tpu.memory_space<vmem>>, vector<16x32xf32>
    %c0_1 = arith.constant 0 : index
    %c0_2 = arith.constant 0 : index
    %1 = vector.load %arg2[%c0_1, %c0_2] : memref<32x32xf32, #tpu.memory_space<vmem>>, vector<32x32xf32>
    %c0_3 = arith.constant 0 : index
    %c0_4 = arith.constant 0 : index
    %2 = vector.load %arg3[%c0_3, %c0_4] : memref<2x32xf32, #tpu.memory_space<vmem>>, vector<2x32xf32>
    %cst = arith.constant dense<0.000000e+00> : vector<16x32xf32>
    %3 = tpu.matmul %0, %1, %cst {dimension_numbers = #tpu.dot_dimension_numbers<[1], [0], [0], [1], [0, 0, 1, 1], [], []>} : vector<16x32xf32>, vector<32x32xf32>, vector<16x32xf32> -> vector<16x32xf32>
    %4 = vector.shape_cast %3 : vector<16x32xf32> to vector<2x8x32xf32>
    %cst_5 = arith.constant dense<0.000000e+00> : vector<2x32xf32>
    %5 = vector.multi_reduction <add>, %4, %cst_5 [1] : vector<2x8x32xf32> to vector<2x32xf32>
    %6 = vector.shape_cast %5 : vector<2x32xf32> to vector<2x1x32xf32>
    %cst_6 = arith.constant 1.250000e-01 : f32
    %7 = vector.broadcast %cst_6 : f32 to vector<2x1x32xf32>
    %8 = arith.mulf %6, %7 : vector<2x1x32xf32>
    %9 = arith.mulf %4, %4 : vector<2x8x32xf32>
    %cst_7 = arith.constant dense<0.000000e+00> : vector<2x32xf32>
    %10 = vector.multi_reduction <add>, %9, %cst_7 [1] : vector<2x8x32xf32> to vector<2x32xf32>
    %11 = vector.shape_cast %10 : vector<2x32xf32> to vector<2x1x32xf32>
    %cst_8 = arith.constant 1.250000e-01 : f32
    %12 = vector.broadcast %cst_8 : f32 to vector<2x1x32xf32>
    %13 = arith.mulf %11, %12 : vector<2x1x32xf32>
    %14 = arith.mulf %8, %8 : vector<2x1x32xf32>
    %15 = arith.subf %13, %14 : vector<2x1x32xf32>
    %16 = vector.broadcast %8 : vector<2x1x32xf32> to vector<2x8x32xf32>
    %17 = arith.subf %4, %16 : vector<2x8x32xf32>
    %cst_9 = arith.constant 9.99999974E-6 : f32
    %18 = vector.broadcast %cst_9 : f32 to vector<2x1x32xf32>
    %19 = arith.addf %15, %18 : vector<2x1x32xf32>
    %20 = math.rsqrt %19 : vector<2x1x32xf32>
    %21 = vector.broadcast %20 : vector<2x1x32xf32> to vector<2x8x32xf32>
    %22 = arith.mulf %17, %21 : vector<2x8x32xf32>
    %23 = vector.shape_cast %22 : vector<2x8x32xf32> to vector<16x32xf32>
    %24 = vector.extract_strided_slice %2 {offsets = [0, 0], sizes = [1, 32], strides = [1, 1]} : vector<2x32xf32> to vector<1x32xf32>
    %25 = vector.broadcast %24 : vector<1x32xf32> to vector<16x32xf32>
    %26 = arith.mulf %23, %25 : vector<16x32xf32>
    %27 = vector.extract_strided_slice %2 {offsets = [1, 0], sizes = [1, 32], strides = [1, 1]} : vector<2x32xf32> to vector<1x32xf32>
    %28 = vector.broadcast %27 : vector<1x32xf32> to vector<16x32xf32>
    %29 = arith.addf %26, %28 : vector<16x32xf32>
    %30 = vector.extract_strided_slice %29 {offsets = [0, 0], sizes = [16, 16], strides = [1, 1]} : vector<16x32xf32> to vector<16x16xf32>
    %31 = vector.extract_strided_slice %29 {offsets = [0, 16], sizes = [16, 16], strides = [1, 1]} : vector<16x32xf32> to vector<16x16xf32>
    %32 = arith.negf %31 : vector<16x16xf32>
    %33 = math.exp %32 : vector<16x16xf32>
    %cst_10 = arith.constant 1.000000e+00 : f32
    %34 = vector.broadcast %cst_10 : f32 to vector<16x16xf32>
    %35 = arith.addf %34, %33 : vector<16x16xf32>
    %36 = arith.divf %34, %35 : vector<16x16xf32>
    %37 = arith.mulf %30, %36 : vector<16x16xf32>
    %c0_11 = arith.constant 0 : index
    %c0_12 = arith.constant 0 : index
    %c0_13 = arith.constant 0 : index
    %38 = vector.load %arg4[%c0_11, %c0_12, %c0_13] : memref<3x16x32xf32, #tpu.memory_space<vmem>>, vector<1x16x32xf32>
    %39 = vector.shape_cast %38 : vector<1x16x32xf32> to vector<16x32xf32>
    %c0_14 = arith.constant 0 : index
    %c0_15 = arith.constant 0 : index
    %c0_16 = arith.constant 0 : index
    %40 = vector.load %arg5[%c0_14, %c0_15, %c0_16] : memref<3x2x32xf32, #tpu.memory_space<vmem>>, vector<1x2x32xf32>
    %41 = vector.shape_cast %40 : vector<1x2x32xf32> to vector<2x32xf32>
    %cst_17 = arith.constant dense<0.000000e+00> : vector<16x32xf32>
    %42 = tpu.matmul %37, %39, %cst_17 {dimension_numbers = #tpu.dot_dimension_numbers<[1], [0], [0], [1], [0, 0, 1, 1], [], []>} : vector<16x16xf32>, vector<16x32xf32>, vector<16x32xf32> -> vector<16x32xf32>
    %43 = vector.shape_cast %42 : vector<16x32xf32> to vector<2x8x32xf32>
    %cst_18 = arith.constant dense<0.000000e+00> : vector<2x32xf32>
    %44 = vector.multi_reduction <add>, %43, %cst_18 [1] : vector<2x8x32xf32> to vector<2x32xf32>
    %45 = vector.shape_cast %44 : vector<2x32xf32> to vector<2x1x32xf32>
    %cst_19 = arith.constant 1.250000e-01 : f32
    %46 = vector.broadcast %cst_19 : f32 to vector<2x1x32xf32>
    %47 = arith.mulf %45, %46 : vector<2x1x32xf32>
    %48 = arith.mulf %43, %43 : vector<2x8x32xf32>
    %cst_20 = arith.constant dense<0.000000e+00> : vector<2x32xf32>
    %49 = vector.multi_reduction <add>, %48, %cst_20 [1] : vector<2x8x32xf32> to vector<2x32xf32>
    %50 = vector.shape_cast %49 : vector<2x32xf32> to vector<2x1x32xf32>
    %cst_21 = arith.constant 1.250000e-01 : f32
    %51 = vector.broadcast %cst_21 : f32 to vector<2x1x32xf32>
    %52 = arith.mulf %50, %51 : vector<2x1x32xf32>
    %53 = arith.mulf %47, %47 : vector<2x1x32xf32>
    %54 = arith.subf %52, %53 : vector<2x1x32xf32>
    %55 = vector.broadcast %47 : vector<2x1x32xf32> to vector<2x8x32xf32>
    %56 = arith.subf %43, %55 : vector<2x8x32xf32>
    %cst_22 = arith.constant 9.99999974E-6 : f32
    %57 = vector.broadcast %cst_22 : f32 to vector<2x1x32xf32>
    %58 = arith.addf %54, %57 : vector<2x1x32xf32>
    %59 = math.rsqrt %58 : vector<2x1x32xf32>
    %60 = vector.broadcast %59 : vector<2x1x32xf32> to vector<2x8x32xf32>
    %61 = arith.mulf %56, %60 : vector<2x8x32xf32>
    %62 = vector.shape_cast %61 : vector<2x8x32xf32> to vector<16x32xf32>
    %63 = vector.extract_strided_slice %41 {offsets = [0, 0], sizes = [1, 32], strides = [1, 1]} : vector<2x32xf32> to vector<1x32xf32>
    %64 = vector.broadcast %63 : vector<1x32xf32> to vector<16x32xf32>
    %65 = arith.mulf %62, %64 : vector<16x32xf32>
    %66 = vector.extract_strided_slice %41 {offsets = [1, 0], sizes = [1, 32], strides = [1, 1]} : vector<2x32xf32> to vector<1x32xf32>
    %67 = vector.broadcast %66 : vector<1x32xf32> to vector<16x32xf32>
    %68 = arith.addf %65, %67 : vector<16x32xf32>
    %69 = vector.extract_strided_slice %68 {offsets = [0, 0], sizes = [16, 16], strides = [1, 1]} : vector<16x32xf32> to vector<16x16xf32>
    %70 = vector.extract_strided_slice %68 {offsets = [0, 16], sizes = [16, 16], strides = [1, 1]} : vector<16x32xf32> to vector<16x16xf32>
    %71 = arith.negf %70 : vector<16x16xf32>
    %72 = math.exp %71 : vector<16x16xf32>
    %cst_23 = arith.constant 1.000000e+00 : f32
    %73 = vector.broadcast %cst_23 : f32 to vector<16x16xf32>
    %74 = arith.addf %73, %72 : vector<16x16xf32>
    %75 = arith.divf %73, %74 : vector<16x16xf32>
    %76 = arith.mulf %69, %75 : vector<16x16xf32>
    %77 = arith.addf %37, %76 : vector<16x16xf32>
    %cst_24 = arith.constant 0.707106769 : f32
    %78 = vector.broadcast %cst_24 : f32 to vector<16x16xf32>
    %79 = arith.mulf %77, %78 : vector<16x16xf32>
    %c1 = arith.constant 1 : index
    %c0_25 = arith.constant 0 : index
    %c0_26 = arith.constant 0 : index
    %80 = vector.load %arg4[%c1, %c0_25, %c0_26] : memref<3x16x32xf32, #tpu.memory_space<vmem>>, vector<1x16x32xf32>
    %81 = vector.shape_cast %80 : vector<1x16x32xf32> to vector<16x32xf32>
    %c1_27 = arith.constant 1 : index
    %c0_28 = arith.constant 0 : index
    %c0_29 = arith.constant 0 : index
    %82 = vector.load %arg5[%c1_27, %c0_28, %c0_29] : memref<3x2x32xf32, #tpu.memory_space<vmem>>, vector<1x2x32xf32>
    %83 = vector.shape_cast %82 : vector<1x2x32xf32> to vector<2x32xf32>
    %cst_30 = arith.constant dense<0.000000e+00> : vector<16x32xf32>
    %84 = tpu.matmul %79, %81, %cst_30 {dimension_numbers = #tpu.dot_dimension_numbers<[1], [0], [0], [1], [0, 0, 1, 1], [], []>} : vector<16x16xf32>, vector<16x32xf32>, vector<16x32xf32> -> vector<16x32xf32>
    %85 = vector.shape_cast %84 : vector<16x32xf32> to vector<2x8x32xf32>
    %cst_31 = arith.constant dense<0.000000e+00> : vector<2x32xf32>
    %86 = vector.multi_reduction <add>, %85, %cst_31 [1] : vector<2x8x32xf32> to vector<2x32xf32>
    %87 = vector.shape_cast %86 : vector<2x32xf32> to vector<2x1x32xf32>
    %cst_32 = arith.constant 1.250000e-01 : f32
    %88 = vector.broadcast %cst_32 : f32 to vector<2x1x32xf32>
    %89 = arith.mulf %87, %88 : vector<2x1x32xf32>
    %90 = arith.mulf %85, %85 : vector<2x8x32xf32>
    %cst_33 = arith.constant dense<0.000000e+00> : vector<2x32xf32>
    %91 = vector.multi_reduction <add>, %90, %cst_33 [1] : vector<2x8x32xf32> to vector<2x32xf32>
    %92 = vector.shape_cast %91 : vector<2x32xf32> to vector<2x1x32xf32>
    %cst_34 = arith.constant 1.250000e-01 : f32
    %93 = vector.broadcast %cst_34 : f32 to vector<2x1x32xf32>
    %94 = arith.mulf %92, %93 : vector<2x1x32xf32>
    %95 = arith.mulf %89, %89 : vector<2x1x32xf32>
    %96 = arith.subf %94, %95 : vector<2x1x32xf32>
    %97 = vector.broadcast %89 : vector<2x1x32xf32> to vector<2x8x32xf32>
    %98 = arith.subf %85, %97 : vector<2x8x32xf32>
    %cst_35 = arith.constant 9.99999974E-6 : f32
    %99 = vector.broadcast %cst_35 : f32 to vector<2x1x32xf32>
    %100 = arith.addf %96, %99 : vector<2x1x32xf32>
    %101 = math.rsqrt %100 : vector<2x1x32xf32>
    %102 = vector.broadcast %101 : vector<2x1x32xf32> to vector<2x8x32xf32>
    %103 = arith.mulf %98, %102 : vector<2x8x32xf32>
    %104 = vector.shape_cast %103 : vector<2x8x32xf32> to vector<16x32xf32>
    %105 = vector.extract_strided_slice %83 {offsets = [0, 0], sizes = [1, 32], strides = [1, 1]} : vector<2x32xf32> to vector<1x32xf32>
    %106 = vector.broadcast %105 : vector<1x32xf32> to vector<16x32xf32>
    %107 = arith.mulf %104, %106 : vector<16x32xf32>
    %108 = vector.extract_strided_slice %83 {offsets = [1, 0], sizes = [1, 32], strides = [1, 1]} : vector<2x32xf32> to vector<1x32xf32>
    %109 = vector.broadcast %108 : vector<1x32xf32> to vector<16x32xf32>
    %110 = arith.addf %107, %109 : vector<16x32xf32>
    %111 = vector.extract_strided_slice %110 {offsets = [0, 0], sizes = [16, 16], strides = [1, 1]} : vector<16x32xf32> to vector<16x16xf32>
    %112 = vector.extract_strided_slice %110 {offsets = [0, 16], sizes = [16, 16], strides = [1, 1]} : vector<16x32xf32> to vector<16x16xf32>
    %113 = arith.negf %112 : vector<16x16xf32>
    %114 = math.exp %113 : vector<16x16xf32>
    %cst_36 = arith.constant 1.000000e+00 : f32
    %115 = vector.broadcast %cst_36 : f32 to vector<16x16xf32>
    %116 = arith.addf %115, %114 : vector<16x16xf32>
    %117 = arith.divf %115, %116 : vector<16x16xf32>
    %118 = arith.mulf %111, %117 : vector<16x16xf32>
    %119 = arith.addf %79, %118 : vector<16x16xf32>
    %cst_37 = arith.constant 0.707106769 : f32
    %120 = vector.broadcast %cst_37 : f32 to vector<16x16xf32>
    %121 = arith.mulf %119, %120 : vector<16x16xf32>
    %c2 = arith.constant 2 : index
    %c0_38 = arith.constant 0 : index
    %c0_39 = arith.constant 0 : index
    %122 = vector.load %arg4[%c2, %c0_38, %c0_39] : memref<3x16x32xf32, #tpu.memory_space<vmem>>, vector<1x16x32xf32>
    %123 = vector.shape_cast %122 : vector<1x16x32xf32> to vector<16x32xf32>
    %c2_40 = arith.constant 2 : index
    %c0_41 = arith.constant 0 : index
    %c0_42 = arith.constant 0 : index
    %124 = vector.load %arg5[%c2_40, %c0_41, %c0_42] : memref<3x2x32xf32, #tpu.memory_space<vmem>>, vector<1x2x32xf32>
    %125 = vector.shape_cast %124 : vector<1x2x32xf32> to vector<2x32xf32>
    %cst_43 = arith.constant dense<0.000000e+00> : vector<16x32xf32>
    %126 = tpu.matmul %121, %123, %cst_43 {dimension_numbers = #tpu.dot_dimension_numbers<[1], [0], [0], [1], [0, 0, 1, 1], [], []>} : vector<16x16xf32>, vector<16x32xf32>, vector<16x32xf32> -> vector<16x32xf32>
    %127 = vector.shape_cast %126 : vector<16x32xf32> to vector<2x8x32xf32>
    %cst_44 = arith.constant dense<0.000000e+00> : vector<2x32xf32>
    %128 = vector.multi_reduction <add>, %127, %cst_44 [1] : vector<2x8x32xf32> to vector<2x32xf32>
    %129 = vector.shape_cast %128 : vector<2x32xf32> to vector<2x1x32xf32>
    %cst_45 = arith.constant 1.250000e-01 : f32
    %130 = vector.broadcast %cst_45 : f32 to vector<2x1x32xf32>
    %131 = arith.mulf %129, %130 : vector<2x1x32xf32>
    %132 = arith.mulf %127, %127 : vector<2x8x32xf32>
    %cst_46 = arith.constant dense<0.000000e+00> : vector<2x32xf32>
    %133 = vector.multi_reduction <add>, %132, %cst_46 [1] : vector<2x8x32xf32> to vector<2x32xf32>
    %134 = vector.shape_cast %133 : vector<2x32xf32> to vector<2x1x32xf32>
    %cst_47 = arith.constant 1.250000e-01 : f32
    %135 = vector.broadcast %cst_47 : f32 to vector<2x1x32xf32>
    %136 = arith.mulf %134, %135 : vector<2x1x32xf32>
    %137 = arith.mulf %131, %131 : vector<2x1x32xf32>
    %138 = arith.subf %136, %137 : vector<2x1x32xf32>
    %139 = vector.broadcast %131 : vector<2x1x32xf32> to vector<2x8x32xf32>
    %140 = arith.subf %127, %139 : vector<2x8x32xf32>
    %cst_48 = arith.constant 9.99999974E-6 : f32
    %141 = vector.broadcast %cst_48 : f32 to vector<2x1x32xf32>
    %142 = arith.addf %138, %141 : vector<2x1x32xf32>
    %143 = math.rsqrt %142 : vector<2x1x32xf32>
    %144 = vector.broadcast %143 : vector<2x1x32xf32> to vector<2x8x32xf32>
    %145 = arith.mulf %140, %144 : vector<2x8x32xf32>
    %146 = vector.shape_cast %145 : vector<2x8x32xf32> to vector<16x32xf32>
    %147 = vector.extract_strided_slice %125 {offsets = [0, 0], sizes = [1, 32], strides = [1, 1]} : vector<2x32xf32> to vector<1x32xf32>
    %148 = vector.broadcast %147 : vector<1x32xf32> to vector<16x32xf32>
    %149 = arith.mulf %146, %148 : vector<16x32xf32>
    %150 = vector.extract_strided_slice %125 {offsets = [1, 0], sizes = [1, 32], strides = [1, 1]} : vector<2x32xf32> to vector<1x32xf32>
    %151 = vector.broadcast %150 : vector<1x32xf32> to vector<16x32xf32>
    %152 = arith.addf %149, %151 : vector<16x32xf32>
    %153 = vector.extract_strided_slice %152 {offsets = [0, 0], sizes = [16, 16], strides = [1, 1]} : vector<16x32xf32> to vector<16x16xf32>
    %154 = vector.extract_strided_slice %152 {offsets = [0, 16], sizes = [16, 16], strides = [1, 1]} : vector<16x32xf32> to vector<16x16xf32>
    %155 = arith.negf %154 : vector<16x16xf32>
    %156 = math.exp %155 : vector<16x16xf32>
    %cst_49 = arith.constant 1.000000e+00 : f32
    %157 = vector.broadcast %cst_49 : f32 to vector<16x16xf32>
    %158 = arith.addf %157, %156 : vector<16x16xf32>
    %159 = arith.divf %157, %158 : vector<16x16xf32>
    %160 = arith.mulf %153, %159 : vector<16x16xf32>
    %161 = arith.addf %121, %160 : vector<16x16xf32>
    %cst_50 = arith.constant 0.707106769 : f32
    %162 = vector.broadcast %cst_50 : f32 to vector<16x16xf32>
    %163 = arith.mulf %161, %162 : vector<16x16xf32>
    %c0_51 = arith.constant 0 : index
    %c0_52 = arith.constant 0 : index
    %164 = vector.load %arg6[%c0_51, %c0_52] : memref<16x16xf32, #tpu.memory_space<vmem>>, vector<16x16xf32>
    tpu.vector_store %arg6[%c0_51, %c0_52], %163 {strides = array<i32>} : memref<16x16xf32, #tpu.memory_space<vmem>>, vector<16x16xf32>,
    return
  }
  func.func @transform_0(%arg0: i32) -> (i32, i32) {
    %c0_i32 = arith.constant 0 : i32
    %c0_i32_0 = arith.constant 0 : i32
    return %arg0, %c0_i32 : i32, i32
  }
  func.func @transform_1(%arg0: i32) -> (i32, i32) {
    %c0_i32 = arith.constant 0 : i32
    %c0_i32_0 = arith.constant 0 : i32
    %c0_i32_1 = arith.constant 0 : i32
    return %c0_i32, %c0_i32_0 : i32, i32
  }
  func.func @transform_2(%arg0: i32) -> (i32, i32) {
    %c0_i32 = arith.constant 0 : i32
    %c0_i32_0 = arith.constant 0 : i32
    %c0_i32_1 = arith.constant 0 : i32
    return %c0_i32, %c0_i32_0 : i32, i32
  }
  func.func @transform_3(%arg0: i32) -> (i32, i32, i32) {
    %c0_i32 = arith.constant 0 : i32
    %c0_i32_0 = arith.constant 0 : i32
    %c0_i32_1 = arith.constant 0 : i32
    %c0_i32_2 = arith.constant 0 : i32
    return %c0_i32, %c0_i32_0, %c0_i32_1 : i32, i32, i32
  }
  func.func @transform_4(%arg0: i32) -> (i32, i32, i32) {
    %c0_i32 = arith.constant 0 : i32
    %c0_i32_0 = arith.constant 0 : i32
    %c0_i32_1 = arith.constant 0 : i32
    %c0_i32_2 = arith.constant 0 : i32
    return %c0_i32, %c0_i32_0, %c0_i32_1 : i32, i32, i32
  }
  func.func @transform_5(%arg0: i32) -> (i32, i32) {
    %c0_i32 = arith.constant 0 : i32
    %c0_i32_0 = arith.constant 0 : i32
    return %arg0, %c0_i32 : i32, i32
  }
}

</mosaic_0001>

<bundles_post_ra>
// kernel: tpu_custom_call.1
= control target key start
LH: loop header
LB: loop body
LE: loop exit
PB: predicated region body
PF: predicated region fallthrough
CT: control target
= control target key end

     0   :  { %10 = vsyncpa [#allocation3], 0  ;;  %s1690_s0 = inlined_call_operand.hbm [shape: f32[32,32], index: 0, kind: input, shape index: {}]   ;;  %s1691_s1 = inlined_call_operand.hbm [shape: f32[32,32], index: 1, kind: input, shape index: {}]   ;;  %s1692_s2 = inlined_call_operand.vmem [shape: f32[2,32], index: 2, kind: input, shape index: {}]   ;;  %s1693_s3 = inlined_call_operand.hbm [shape: f32[3,16,32], index: 3, kind: input, shape index: {}]   ;;  %s1694_s4 = inlined_call_operand.vmem [shape: f32[3,2,32], index: 4, kind: input, shape index: {}]   ;;  %s1695_s5 = inlined_call_operand.vmem [shape: f32[32,16], index: 5, kind: output, shape index: {}]  }
   0x1   :  { %12 = vsyncpa [#allocation3 + $0x1], 0 }
   0x2   :  { %13 = vsyncpa [#allocation5], 0  ;;  %s1421_s18 = smov 0   ;;  %s1423_s19 = smov 0  }
   0x3   :  { %s1425_s20 = smov 0   ;;  %s1427_s21 = smov 0  }
   0x4 LB: > { %s1042_s22 = sadd.s32 4294967295, %s1383_s21   ;;  %p39_p0 = scmp.ne.s32.totalorder %s1375_s19, %s1371_s18  ;;  %s1383_s21 = sphi %s1427_s21, %s1711_s21   ;;  %s1379_s20 = sphi %s1425_s20, %s1710_s20   ;;  %s1375_s19 = sphi %s1423_s19, %s1709_s19   ;;  %s1371_s18 = sphi %s1421_s18, %s1708_s18  }
   0x5   : > { %p1443_p1 = scmp.eq.s32.totalorder %s1042_s22, 0  ;;  %p1044_p2 = scmp.ge.s32.totalorder %s1383_s21, 1 }
   0x6   : > { %p160_p3 = scmp.lt.s32.totalorder %s1383_s21, 3  ;;  %s1385_s26 = smov [#allocation4]  }
   0x7   : > { %s1700_s23 = scalar_select %p1443_p1, 1, 0 }
   0x8   : > { %p1451_p4 = por %p1443_p1, %p39_p0  ;;  %p1455_p5 = pnand %p1044_p2, %p160_p3 }
   0x9   : > { %s172_s27 = sshll.u32 %s1385_s26, 4  ;;  %s1386_s29 = smov [#allocation6]   ;;  %s173_s27 = int_to_ptr.vmem [resolvable:$true] %s172_s27 }
   0xa   : > { %s1701_s24 = scalar_select %p1451_p4, 1, 0 }
   0xb   : > { %s1702_s25 = scalar_select %p1455_p5, 1, 0 }
   0xc   : > { %p1158_p6 = pneg %p1455_p5  ;;  %s188_s30 = sshll.u32 %s1386_s29, 4  ;;  %s1467_s30 = int_to_ptr.vmem [resolvable:$true] %s188_s30 }
   0xd   : > { %s1259_s8 = scalar_lea.hbm %s1691_s1, 512 }
   0xe   : > { %p1463_p7 = pnand %p1158_p6, %p1443_p1  ;;  %p1260_p8 = scmp.ne.s32.totalorder %s1691_s1, %s1259_s8 }
   0xf   : > { %p1266_p12 = scmp.lt.u32.totalorder %s1259_s8, %s1691_s1 }
  0x10   : > { %p1261_p9 = pneg %p1463_p7 }
  0x12   : > { %p1262_p10 = pnand %p1261_p9, %p1260_p8 }
  0x14   : > { %p1263_p11 = pneg %p1262_p10 }
  0x16   : > { %p1268_p13 = pnand %p1266_p12, %p1263_p11 }
  0x18   : > { %1271 = shalt.err (!%p1268_p13)
}
  0x19   : > { %s1272_s13 = scalar_lea.vmem %s173_s27, 512  ;;  %p1280_p6 = scmp.lt.s32.totalorder %s173_s27, %s173_s27 }
  0x1a   : > { %p1273_p0 = scmp.ne.s32.totalorder %s173_s27, %s1272_s13  ;;  %p1281_p1 = scmp.lt.s32.totalorder %s1272_s13, %s1272_s13 }
  0x1c   : > { %p1275_p2 = pnand %p1273_p0, %p1261_p9  ;;  %p1282_p4 = por %p1281_p1, %p1280_p6 }
  0x1e   : > { %p1276_p3 = pneg %p1275_p2 }
  0x20   : > { %p1283_p5 = pnand %p1282_p4, %p1276_p3 }
  0x22   : > { %1286 = shalt.err (!%p1283_p5)
}
  0x23   : > { %s1387_s14 = smov 128   ;;  %s1388_s15 = smov 8  }
  0x24   : > { %1161 = dma.hbm_to_vmem [thread:$0]  (!%p1463_p7), %s1691_s1, 512, %s173_s27, [#allocation5], %s1387_s14, %s1387_s14, %s1388_s15  }
  0x25   : > { %s1287_s29 = scalar_lea.hbm %s1693_s3, 768 }
  0x26   : > { %p1288_p1 = scmp.ne.s32.totalorder %s1693_s3, %s1287_s29  ;;  %p1294_p8 = scmp.lt.u32.totalorder %s1287_s29, %s1693_s3 }
  0x28   : > { %p1290_p4 = pnand %p1288_p1, %p1261_p9 }
  0x2a   : > { %p1291_p5 = pneg %p1290_p4 }
  0x2c   : > { %p1296_p10 = pnand %p1294_p8, %p1291_p5 }
  0x2e   : > { %1299 = shalt.err (!%p1296_p10)
}
  0x2f   : > { %s1300_s27 = scalar_lea.vmem %s1467_s30, 768  ;;  %p1308_p0 = scmp.lt.s32.totalorder %s1467_s30, %s1467_s30 }
  0x30   : > { %p1301_p11 = scmp.ne.s32.totalorder %s1467_s30, %s1300_s27  ;;  %p1309_p2 = scmp.lt.s32.totalorder %s1300_s27, %s1300_s27 }
  0x32   : > { %p1303_p12 = pnand %p1301_p11, %p1261_p9  ;;  %p1310_p3 = por %p1309_p2, %p1308_p0 }
  0x34   : > { %p1304_p13 = pneg %p1303_p12 }
  0x36   : > { %p1311_p6 = pnand %p1310_p3, %p1304_p13 }
  0x38   : > { %1314 = shalt.err (!%p1311_p6)
}
  0x39   : > { %1164 = dma.hbm_to_vmem [thread:$0]  (!%p1463_p7), %s1693_s3, 768, %s1467_s30, [#allocation5], %s1387_s14, %s1387_s14, %s1388_s15  }
  0x3a   : > { %s1523_s12 = sadd.s32 1, %s1383_s21   ;;  %s26_s28 = sadd.s32 1, %s1379_s20 }
  0x3b   : > { %s23_s13 = ssub.s32 %s1383_s21, %s1523_s12  ;;  %p33_p9 = scmp.ne.s32.totalorder %s1379_s20, %s1375_s19 }
  0x3c   : > { %p24_p1 = scmp.eq.s32.totalorder %s23_s13, 0  ;;  %p34_p4 = scmp.eq.s32.totalorder %s1383_s21, 0 }
  0x3d   : > { %p1171_p5 = scmp.lt.s32.totalorder %s1383_s21, 2  ;;  %s205_s16 = sand.u32 1, %s1379_s20  }
  0x3e   : > { %s1534_s17 = scalar_select %p24_p1, %s1379_s20, %s26_s28  }
  0x3f   : > { %p35_p8 = por %p34_p4, %p33_p9  ;;  %s1048_s18 = sshll.u32 %s205_s16, 4 }
  0x40   : > { %s1077_s26 = sshll.u32 %s1383_s21, 8  ;;  %s209_s30 = scalar_lea.vmem [#allocation2], %s1048_s18 }
  0x41   : > { %s1540_s7 = scalar_lea.hbm %s1690_s0, %s1077_s26  ;;  %s216_s8 = sshll.u32 %s209_s30, 4  ;;  %s1546_s8 = int_to_ptr.vmem [resolvable:$true] %s216_s8 }
  0x42   : > { %p1542_p7 = pnand %p1171_p5, %p35_p8  ;;  %s1548_s27 = scalar_lea.sflag [#allocation3], %s205_s16 }
  0x43   : > { %s1315_s10 = scalar_lea.hbm %s1540_s7, 256  ;;  %s1320_s13 = scalar_lea.hbm %s1690_s0, 512 }
  0x44   : > { %p1316_p10 = scmp.ne.s32.totalorder %s1540_s7, %s1315_s10  ;;  %p1317_p11 = pneg %p1542_p7 }
  0x45   : > { %p1321_p0 = scmp.lt.u32.totalorder %s1540_s7, %s1690_s0  ;;  %p1322_p2 = scmp.lt.u32.totalorder %s1320_s13, %s1315_s10 }
  0x46   : > { %p1318_p12 = pnand %p1317_p11, %p1316_p10  ;;  %p1324_p6 = scmp.lt.u32.totalorder %s1315_s10, %s1540_s7 }
  0x47   : > { %p1323_p3 = por %p1322_p2, %p1321_p0 }
  0x48   : > { %p1319_p13 = pneg %p1318_p12 }
  0x49   : > { %p1325_p9 = por %p1324_p6, %p1323_p3 }
  0x4b   : > { %p1326_p1 = pnand %p1325_p9, %p1319_p13 }
  0x4d   : > { %1329 = shalt.err (!%p1326_p1)
}
  0x4e   : > { %s1330_s16 = scalar_lea.vmem %s1546_s8, 256  ;;  %s1389_s29 = smov [#allocation2]  }
  0x4f   : > { %p1331_p4 = scmp.ne.s32.totalorder %s1546_s8, %s1330_s16  ;;  %s1335_s6 = sshll.u32 %s1389_s29, 4  ;;  %s1336_s6 = int_to_ptr.vmem [resolvable:$false] %s1335_s6 }
  0x50   : > { %s1337_s30 = scalar_lea.vmem %s1336_s6, 512  ;;  %p1338_p10 = scmp.lt.s32.totalorder %s1546_s8, %s1336_s6 }
  0x51   : > { %p1333_p5 = pnand %p1331_p4, %p1317_p11  ;;  %p1339_p12 = scmp.lt.s32.totalorder %s1337_s30, %s1330_s16 }
  0x53   : > { %p1334_p8 = pneg %p1333_p5  ;;  %p1340_p0 = por %p1339_p12, %p1338_p10 }
  0x55   : > { %p1341_p2 = pnand %p1340_p0, %p1334_p8 }
  0x57   : > { %1344 = shalt.err (!%p1341_p2)
}
  0x58   : > { %1168 = dma.hbm_to_vmem [thread:$0]  (!%p1542_p7), %s1540_s7, 256, %s1546_s8, %s1548_s27, %s1387_s14, %s1387_s14, %s1388_s15  }
  0x59   : > { %p1705_p11 = scmp.ne.s32.totalorder %s1702_s25, 0 }
  0x5a   : > { %s230_s10 = sand.u32 (!%p1705_p11), 1, %s1375_s19   ;;  %p1706_p13 = scmp.ne.s32.totalorder (!%p1705_p11), %s1701_s24, 0 }
  0x5b   : > { %228 = sbr.rel (%p1705_p11) target bundleno = 1711 (0x6af), region = 40  ;;  %s1052_s11 = sshll.u32 (!%p1705_p11), %s230_s10, 4 }
  0x5c   : > { %s231_s28 = scalar_lea.sflag (!%p1705_p11), [#allocation3], %s230_s10  ;;  %s234_s13 = scalar_lea.vmem (!%p1705_p11), [#allocation2], %s1052_s11 }
  0x62   : > { %1362 = dma.done.wait (%p1706_p13), %s231_s28, 256  }
  0x63   : > { %1364 = vsyncadd (%p1706_p13), %s231_s28, 4294967040  ;;  %p1707_p3 = scmp.ne.s32.totalorder %s1700_s23, 0 }
  0x65   : > { %1366 = dma.done.wait (%p1707_p3), [#allocation5], 1280  }
  0x66   : > { %1368 = vsyncadd (%p1707_p3), [#allocation5], 4294966016  ;;  %vm283_vm0 = vcmask 261120   ;;  %v278_v0 = vld [vmem:[#allocation4] sm:$0xff]  ;;  %v279_v1 = vld [vmem:[#allocation4 + $0x8] sm:$0xff]  ;;  %v411_v47 = vlaneseq  ;;  %s1390_s25 = smov 112  }
  0x67   : > { %v280_v2 = vld [vmem:[#allocation4 + $0x10] sm:$0xff]  ;;  %v1128_v3 = vpack.c.bf16 %v279_v1, %v278_v0  ;;  %v281_v4 = vld [vmem:[#allocation4 + $0x18] sm:$0xff]  ;;  %v282_v53 = vld [vmem:[%s1692_s2] sm:$0x3]  ;;  %vm448_vm1 = vcmask 130048   ;;  %s1055_s18 = sshll.u32 %s1042_s22, 1 }
  0x68   : > { %v276_v5 = vld [vmem:[%s234_s13] sm:$0xff]  ;;  %v1132_v6 = vpack.c.bf16 %v281_v4, %v280_v2  ;;  %v277_v7 = vld [vmem:[%s234_s13 + $0x8] sm:$0xff]  ;;  %v412_v51 = vshrl.u32 %v411_v47, 7  ;;  %p271_p7 = scmp.lt.s32.totalorder %s1055_s18, 3 }
  0x69   : > { %1104 = vmatprep.mubr.msk.f32.mxu0 %vm283_vm0, %v276_v5  ;;  %1129 = vmatprep.subr.bf16.mxu0 %v1128_v3 }
  0x6a   : > { %1131 = vmatpush3.bf16.msra.mxu0 %v1128_v3  ;;  %v1596_v52 = vsub.s32 0, %v412_v51  ;;  %v1601_v54 = vsub.s32 1, %v412_v51  ;;  %s1713_s18 = smov (!%p271_p7, %s1055_s18), 3 }
  0x6b   : > { %1133 = vmatprep.subr.bf16.mxu0 %v1132_v6  ;;  %s1056_s26 = sshll.u32 %s1713_s18, 3 }
  0x6c   : > { %v414_v56 = vrot.slane %v282_v53, %v1596_v52  ;;  %v420_v61 = vrot.slane %v282_v53, %v1601_v54  ;;  %s274_s6 = scalar_lea.vmem %s1695_s5, %s1056_s26 }
  0x6e   : > { %1135 = vmatpush3.bf16.msra.mxu0 %v1132_v6 }
  0x71   : > { %1105 = vmatmul.mubr.msk.f32.vlgmr.msra.gmra.mrb[0].mxu0 %vm283_vm0, %v277_v7  ;;  %v445_v7 = vld [vmem:[#allocation6] sm:$0xff] }
 0x144   : > { %v1106_v8 = vpop.f32.mrb[0].mxu0 }
 0x145   : > { %v372_v9 = vsel %vm283_vm0, %v1106_v8, 0.0  ;;  %v382_v10 = vmul.f32 %v1106_v8, %v1106_v8  ;;  %v356_v11 = vpop.f32.mrb[1].mxu0 }
 0x146   : > { %v373_v12 = vrot.slane %v372_v9, 4  ;;  %v365_v13 = vsel %vm283_vm0, %v356_v11, 0.0  ;;  %v381_v14 = vmul.f32 %v356_v11, %v356_v11 }
 0x147   : > { %v390_v15 = vsel %vm283_vm0, %v382_v10, 0.0  ;;  %v366_v16 = vrot.slane %v365_v13, 4 }
 0x148   : > { %v374_v17 = vadd.f32 %v373_v12, %v372_v9  ;;  %v391_v18 = vrot.slane %v390_v15, 4  ;;  %v383_v19 = vsel %vm283_vm0, %v381_v14, 0.0 }
 0x149   : > { %v367_v20 = vadd.f32 %v366_v16, %v365_v13  ;;  %v384_v21 = vrot.slane %v383_v19, 4 }
 0x14a   : > { %v375_v22 = vrot.slane %v374_v17, 2  ;;  %v392_v23 = vadd.f32 %v391_v18, %v390_v15 }
 0x14b   : > { %v368_v24 = vrot.slane %v367_v20, 2  ;;  %v385_v25 = vadd.f32 %v384_v21, %v383_v19 }
 0x14c   : > { %v376_v26 = vadd.f32 %v375_v22, %v374_v17  ;;  %v393_v27 = vrot.slane %v392_v23, 2 }
 0x14d   : > { %v369_v28 = vadd.f32 %v368_v24, %v367_v20  ;;  %v386_v29 = vrot.slane %v385_v25, 2 }
 0x14e   : > { %v377_v30 = vrot.slane %v376_v26, 1  ;;  %v394_v31 = vadd.f32 %v393_v27, %v392_v23 }
 0x14f   : > { %v370_v32 = vrot.slane %v369_v28, 1  ;;  %v387_v33 = vadd.f32 %v386_v29, %v385_v25 }
 0x150   : > { %v378_v34 = vadd.f32 %v377_v30, %v376_v26  ;;  %v395_v35 = vrot.slane %v394_v31, 1 }
 0x151   : > { %v371_v36 = vadd.f32 %v370_v32, %v369_v28  ;;  %v388_v37 = vrot.slane %v387_v33, 1 }
 0x152   : > { %v380_v38 = vmul.f32 0.125, %v378_v34  ;;  %v396_v39 = vadd.f32 %v395_v35, %v394_v31 }
 0x153   : > { %v379_v40 = vmul.f32 0.125, %v371_v36  ;;  %v389_v41 = vadd.f32 %v388_v37, %v387_v33 }
 0x154   : > { %v398_v42 = vmul.f32 0.125, %v396_v39  ;;  %v400_v43 = vmul.f32 %v380_v38, %v380_v38  ;;  %v404_v55 = vsub.f32 %v1106_v8, %v380_v38  ;;  %v446_v8 = vld [vmem:[#allocation6 + $0x8] sm:$0xff] }
 0x155   : > { %v397_v44 = vmul.f32 0.125, %v389_v41  ;;  %v399_v45 = vmul.f32 %v379_v40, %v379_v40  ;;  %v403_v58 = vsub.f32 %v356_v11, %v379_v40  ;;  %v1136_v10 = vpack.c.bf16 %v446_v8, %v445_v7 }
 0x156   : > { %v402_v46 = vsub.f32 %v398_v42, %v400_v43 }
 0x157   : > { %v401_v48 = vsub.f32 %v397_v44, %v399_v45  ;;  %1137 = vmatprep.subr.bf16.mxu1 %v1136_v10 }
 0x158   : > { %v406_v49 = vadd.f32 1e-05, %v402_v46  ;;  %1139 = vmatpush3.bf16.msra.mxu1 %v1136_v10 }
 0x159   : > { %v405_v50 = vadd.f32 1e-05, %v401_v48 }
 0x15a   : > { %1211 = vrsqrt.f32 %v406_v49 }
 0x15b   : > { %1213 = vrsqrt.f32 %v405_v50 }
 0x164   : > { %v1212_v57 = vpop.eup %1211 }
 0x165   : > { %v1214_v59 = vpop.eup %1213  ;;  %v410_v60 = vmul.f32 %v1212_v57, %v404_v55 }
 0x166   : > { %v409_v62 = vmul.f32 %v1214_v59, %v403_v58 }
 0x167   : > { %v416_v63 = vmul.f32 %v414_v56, %v410_v60 }
 0x168   : > { %v415_v0 = vmul.f32 %v414_v56, %v409_v62  ;;  %v447_v62 = vld [vmem:[%s1694_s4] sm:$0x3] }
 0x169   : > { %v422_v1 = vadd.f32 %v420_v61, %v416_v63 }
 0x16a   : > { %v421_v2 = vadd.f32 %v420_v61, %v415_v0  ;;  %v579_v0 = vrot.slane %v447_v62, %v1596_v52 }
 0x16b   : > { %v1060_v3 = vmul.f32 -1.442695, %v422_v1 }
 0x16c   : > { %v1059_v4 = vmul.f32 -1.442695, %v421_v2 }
 0x16d   : > { %1215 = vpow2.f32 %v1060_v3 }
 0x16e   : > { %1217 = vpow2.f32 %v1059_v4 }
 0x177   : > { %v1216_v5 = vpop.eup %1215 }
 0x178   : > { %v1218_v6 = vpop.eup %1217  ;;  %v430_v11 = vadd.f32 1.0, %v1216_v5  ;;  %v585_v5 = vrot.slane %v447_v62, %v1601_v54 }
 0x179   : > { %v429_v9 = vadd.f32 1.0, %v1218_v6 }
 0x17b   : > { %1219 = vrcp.f32 %v429_v9 }
 0x17c   : > { %1221 = vrcp.f32 %v430_v11 }
 0x185   : > { %v1220_v12 = vpop.eup %1219 }
 0x186   : > { %437 = vrot.lane.b32.xlu0 %v1220_v12, %s1390_s25  ;;  %v1222_v13 = vpop.eup %1221 }
 0x18a   : > { %439 = vrot.lane.b32.xlu0 %v1222_v13, %s1390_s25 }
 0x1f8   : > { %v438_v14 = vpop.permute.xlu0 %437 }
 0x1f9   : > { %v1607_v15 = vmul.f32 %v438_v14, %v421_v2 }
 0x1fb   : > { %1111 = vmatprep.mubr.msk.f32.mxu1 %vm448_vm1, %v1607_v15 }
 0x1fc   : > { %v440_v16 = vpop.permute.xlu0 %439 }
 0x1fd   : > { %v1611_v17 = vmul.f32 %v440_v16, %v422_v1 }
 0x1ff   : > { %1112 = vmatmul.mubr.msk.f32.vlgmr.msra.gmra.mrb[0].mxu1 %vm448_vm1, %v1611_v17 }
 0x2d2   : > { %v1113_v18 = vpop.f32.mrb[0].mxu1 }
 0x2d3   : > { %v537_v19 = vsel %vm283_vm0, %v1113_v18, 0.0  ;;  %v547_v20 = vmul.f32 %v1113_v18, %v1113_v18  ;;  %v521_v21 = vpop.f32.mrb[1].mxu1 }
 0x2d4   : > { %v538_v22 = vrot.slane %v537_v19, 4  ;;  %v530_v23 = vsel %vm283_vm0, %v521_v21, 0.0  ;;  %v546_v24 = vmul.f32 %v521_v21, %v521_v21 }
 0x2d5   : > { %v555_v25 = vsel %vm283_vm0, %v547_v20, 0.0  ;;  %v531_v26 = vrot.slane %v530_v23, 4  ;;  %v616_v20 = vld [vmem:[#allocation6 + $0x18] sm:$0xff] }
 0x2d6   : > { %v539_v27 = vadd.f32 %v538_v22, %v537_v19  ;;  %v556_v28 = vrot.slane %v555_v25, 4  ;;  %v548_v29 = vsel %vm283_vm0, %v546_v24, 0.0  ;;  %v615_v19 = vld [vmem:[#allocation6 + $0x10] sm:$0xff] }
 0x2d7   : > { %v532_v30 = vadd.f32 %v531_v26, %v530_v23  ;;  %v549_v31 = vrot.slane %v548_v29, 4 }
 0x2d8   : > { %v540_v32 = vrot.slane %v539_v27, 2  ;;  %v557_v33 = vadd.f32 %v556_v28, %v555_v25 }
 0x2d9   : > { %v533_v34 = vrot.slane %v532_v30, 2  ;;  %v550_v35 = vadd.f32 %v549_v31, %v548_v29 }
 0x2da   : > { %v541_v36 = vadd.f32 %v540_v32, %v539_v27  ;;  %v558_v37 = vrot.slane %v557_v33, 2 }
 0x2db   : > { %v534_v38 = vadd.f32 %v533_v34, %v532_v30  ;;  %v551_v39 = vrot.slane %v550_v35, 2 }
 0x2dc   : > { %v542_v40 = vrot.slane %v541_v36, 1  ;;  %v559_v41 = vadd.f32 %v558_v37, %v557_v33 }
 0x2dd   : > { %v535_v42 = vrot.slane %v534_v38, 1  ;;  %v552_v43 = vadd.f32 %v551_v39, %v550_v35 }
 0x2de   : > { %v543_v44 = vadd.f32 %v542_v40, %v541_v36  ;;  %v560_v45 = vrot.slane %v559_v41, 1 }
 0x2df   : > { %v536_v46 = vadd.f32 %v535_v42, %v534_v38  ;;  %v553_v47 = vrot.slane %v552_v43, 1 }
 0x2e0   : > { %v545_v48 = vmul.f32 0.125, %v543_v44  ;;  %v561_v49 = vadd.f32 %v560_v45, %v559_v41 }
 0x2e1   : > { %v544_v50 = vmul.f32 0.125, %v536_v46  ;;  %v554_v51 = vadd.f32 %v553_v47, %v552_v43 }
 0x2e2   : > { %v563_v53 = vmul.f32 0.125, %v561_v49  ;;  %v565_v55 = vmul.f32 %v545_v48, %v545_v48  ;;  %v569_v63 = vsub.f32 %v1113_v18, %v545_v48 }
 0x2e3   : > { %v562_v56 = vmul.f32 0.125, %v554_v51  ;;  %v564_v57 = vmul.f32 %v544_v50, %v544_v50  ;;  %v568_v2 = vsub.f32 %v521_v21, %v544_v50  ;;  %v1140_v21 = vpack.c.bf16 %v616_v20, %v615_v19 }
 0x2e4   : > { %v567_v58 = vsub.f32 %v563_v53, %v565_v55 }
 0x2e5   : > { %v566_v59 = vsub.f32 %v562_v56, %v564_v57  ;;  %1141 = vmatprep.subr.bf16.mxu1 %v1140_v21 }
 0x2e6   : > { %v571_v60 = vadd.f32 1e-05, %v567_v58  ;;  %1143 = vmatpush3.bf16.msra.mxu1 %v1140_v21 }
 0x2e7   : > { %v570_v61 = vadd.f32 1e-05, %v566_v59 }
 0x2e8   : > { %1223 = vrsqrt.f32 %v571_v60 }
 0x2e9   : > { %1225 = vrsqrt.f32 %v570_v61 }
 0x2f2   : > { %v1224_v1 = vpop.eup %1223 }
 0x2f3   : > { %v1226_v3 = vpop.eup %1225  ;;  %v575_v4 = vmul.f32 %v1224_v1, %v569_v63 }
 0x2f4   : > { %v574_v6 = vmul.f32 %v1226_v3, %v568_v2 }
 0x2f5   : > { %v581_v7 = vmul.f32 %v579_v0, %v575_v4 }
 0x2f6   : > { %v580_v8 = vmul.f32 %v579_v0, %v574_v6 }
 0x2f7   : > { %v587_v9 = vadd.f32 %v585_v5, %v581_v7 }
 0x2f8   : > { %v586_v10 = vadd.f32 %v585_v5, %v580_v8 }
 0x2f9   : > { %v1064_v11 = vmul.f32 -1.442695, %v587_v9 }
 0x2fa   : > { %v1063_v12 = vmul.f32 -1.442695, %v586_v10 }
 0x2fb   : > { %1227 = vpow2.f32 %v1064_v11 }
 0x2fc   : > { %1229 = vpow2.f32 %v1063_v12 }
 0x305   : > { %v1228_v13 = vpop.eup %1227 }
 0x306   : > { %v1230_v14 = vpop.eup %1229  ;;  %v595_v18 = vadd.f32 1.0, %v1228_v13 }
 0x307   : > { %v594_v16 = vadd.f32 1.0, %v1230_v14 }
 0x309   : > { %1231 = vrcp.f32 %v594_v16 }
 0x30a   : > { %1233 = vrcp.f32 %v595_v18 }
 0x313   : > { %v1232_v22 = vpop.eup %1231 }
 0x314   : > { %602 = vrot.lane.b32.xlu1 %v1232_v22, %s1390_s25  ;;  %v1234_v23 = vpop.eup %1233 }
 0x318   : > { %604 = vrot.lane.b32.xlu1 %v1234_v23, %s1390_s25 }
 0x386   : > { %v603_v24 = vpop.permute.xlu1 %602 }
 0x387   : > { %v608_v25 = vmul.f32 %v603_v24, %v586_v10  ;;  %v1065_v10 = vld [vmem:[%s1694_s4 + $0x2] sm:$0x3] }
 0x388   : > { %v749_v12 = vrot.slane %v1065_v10, %v1596_v52  ;;  %v755_v19 = vrot.slane %v1065_v10, %v1601_v54 }
 0x389   : > { %v610_v26 = vadd.f32 %v608_v25, %v1607_v15 }
 0x38a   : > { %v605_v27 = vpop.permute.xlu1 %604 }
 0x38b   : > { %v1627_v28 = vmul.f32 0.70710677, %v610_v26  ;;  %v609_v29 = vmul.f32 %v605_v27, %v587_v9 }
 0x38d   : > { %v611_v30 = vadd.f32 %v609_v29, %v1611_v17  ;;  %1118 = vmatprep.mubr.msk.f32.mxu1 %vm448_vm1, %v1627_v28 }
 0x38f   : > { %v1632_v31 = vmul.f32 0.70710677, %v611_v30 }
 0x391   : > { %1119 = vmatmul.mubr.msk.f32.vlgmr.msra.gmra.mrb[2].mxu1 %vm448_vm1, %v1632_v31 }
 0x464   : > { %v1120_v32 = vpop.f32.mrb[2].mxu1 }
 0x465   : > { %v707_v33 = vsel %vm283_vm0, %v1120_v32, 0.0  ;;  %v717_v34 = vmul.f32 %v1120_v32, %v1120_v32  ;;  %v691_v35 = vpop.f32.mrb[3].mxu1 }
 0x466   : > { %v708_v15 = vrot.slane %v707_v33, 4  ;;  %v700_v36 = vsel %vm283_vm0, %v691_v35, 0.0  ;;  %v716_v37 = vmul.f32 %v691_v35, %v691_v35 }
 0x467   : > { %v725_v38 = vsel %vm283_vm0, %v717_v34, 0.0  ;;  %v701_v17 = vrot.slane %v700_v36, 4  ;;  %v786_v34 = vld [vmem:[#allocation6 + $0x28] sm:$0xff] }
 0x468   : > { %v709_v39 = vadd.f32 %v708_v15, %v707_v33  ;;  %v726_v40 = vrot.slane %v725_v38, 4  ;;  %v718_v41 = vsel %vm283_vm0, %v716_v37, 0.0  ;;  %v785_v33 = vld [vmem:[#allocation6 + $0x20] sm:$0xff] }
 0x469   : > { %v702_v42 = vadd.f32 %v701_v17, %v700_v36  ;;  %v719_v43 = vrot.slane %v718_v41, 4 }
 0x46a   : > { %v710_v44 = vrot.slane %v709_v39, 2  ;;  %v727_v45 = vadd.f32 %v726_v40, %v725_v38 }
 0x46b   : > { %v703_v46 = vrot.slane %v702_v42, 2  ;;  %v720_v47 = vadd.f32 %v719_v43, %v718_v41 }
 0x46c   : > { %v711_v48 = vadd.f32 %v710_v44, %v709_v39  ;;  %v728_v49 = vrot.slane %v727_v45, 2 }
 0x46d   : > { %v704_v50 = vadd.f32 %v703_v46, %v702_v42  ;;  %v721_v51 = vrot.slane %v720_v47, 2 }
 0x46e   : > { %v712_v53 = vrot.slane %v711_v48, 1  ;;  %v729_v55 = vadd.f32 %v728_v49, %v727_v45 }
 0x46f   : > { %v705_v56 = vrot.slane %v704_v50, 1  ;;  %v722_v57 = vadd.f32 %v721_v51, %v720_v47 }
 0x470   : > { %v713_v58 = vadd.f32 %v712_v53, %v711_v48  ;;  %v730_v59 = vrot.slane %v729_v55, 1 }
 0x471   : > { %v706_v60 = vadd.f32 %v705_v56, %v704_v50  ;;  %v723_v61 = vrot.slane %v722_v57, 1 }
 0x472   : > { %v715_v62 = vmul.f32 0.125, %v713_v58  ;;  %v731_v63 = vadd.f32 %v730_v59, %v729_v55 }
 0x473   : > { %v714_v0 = vmul.f32 0.125, %v706_v60  ;;  %v724_v1 = vadd.f32 %v723_v61, %v722_v57 }
 0x474   : > { %v733_v2 = vmul.f32 0.125, %v731_v63  ;;  %v735_v3 = vmul.f32 %v715_v62, %v715_v62  ;;  %v739_v11 = vsub.f32 %v1120_v32, %v715_v62 }
 0x475   : > { %v732_v4 = vmul.f32 0.125, %v724_v1  ;;  %v734_v5 = vmul.f32 %v714_v0, %v714_v0  ;;  %v738_v14 = vsub.f32 %v691_v35, %v714_v0  ;;  %v1144_v35 = vpack.c.bf16 %v786_v34, %v785_v33 }
 0x476   : > { %v737_v6 = vsub.f32 %v733_v2, %v735_v3 }
 0x477   : > { %v736_v7 = vsub.f32 %v732_v4, %v734_v5  ;;  %1145 = vmatprep.subr.bf16.mxu0 %v1144_v35 }
 0x478   : > { %v741_v8 = vadd.f32 1e-05, %v737_v6  ;;  %1147 = vmatpush3.bf16.msra.mxu0 %v1144_v35 }
 0x479   : > { %v740_v9 = vadd.f32 1e-05, %v736_v7 }
 0x47a   : > { %1235 = vrsqrt.f32 %v741_v8 }
 0x47b   : > { %1237 = vrsqrt.f32 %v740_v9 }
 0x484   : > { %v1236_v13 = vpop.eup %1235 }
 0x485   : > { %v1238_v16 = vpop.eup %1237  ;;  %v745_v18 = vmul.f32 %v1236_v13, %v739_v11 }
 0x486   : > { %v744_v20 = vmul.f32 %v1238_v16, %v738_v14 }
 0x487   : > { %v751_v21 = vmul.f32 %v749_v12, %v745_v18 }
 0x488   : > { %v750_v22 = vmul.f32 %v749_v12, %v744_v20 }
 0x489   : > { %v757_v23 = vadd.f32 %v755_v19, %v751_v21 }
 0x48a   : > { %v756_v24 = vadd.f32 %v755_v19, %v750_v22 }
 0x48b   : > { %v1069_v25 = vmul.f32 -1.442695, %v757_v23 }
 0x48c   : > { %v1068_v26 = vmul.f32 -1.442695, %v756_v24 }
 0x48d   : > { %1239 = vpow2.f32 %v1069_v25 }
 0x48e   : > { %1241 = vpow2.f32 %v1068_v26 }
 0x497   : > { %v1240_v27 = vpop.eup %1239 }
 0x498   : > { %v1242_v29 = vpop.eup %1241  ;;  %v765_v30 = vadd.f32 1.0, %v1240_v27 }
 0x499   : > { %v764_v32 = vadd.f32 1.0, %v1242_v29 }
 0x49a   : > { %1243 = vrcp.f32 %v765_v30 }
 0x49b   : > { %1245 = vrcp.f32 %v764_v32 }
 0x4a4   : > { %v1244_v15 = vpop.eup %1243 }
 0x4a5   : > { %v1246_v36 = vpop.eup %1245  ;;  %774 = vrot.lane.b32.xlu1 %v1244_v15, %s1390_s25 }
 0x4a6   : > { %772 = vrot.lane.b32.xlu0 %v1246_v36, %s1390_s25 }
 0x517   : > { %v775_v37 = vpop.permute.xlu1 %774 }
 0x518   : > { %v779_v38 = vmul.f32 %v775_v37, %v757_v23  ;;  %v773_v17 = vpop.permute.xlu0 %772 }
 0x519   : > { %v778_v39 = vmul.f32 %v773_v17, %v756_v24  ;;  %v1070_v24 = vld [vmem:[%s1694_s4 + $0x4] sm:$0x3] }
 0x51a   : > { %v781_v40 = vadd.f32 %v779_v38, %v1632_v31  ;;  %v919_v26 = vrot.slane %v1070_v24, %v1596_v52  ;;  %v925_v33 = vrot.slane %v1070_v24, %v1601_v54 }
 0x51b   : > { %v780_v41 = vadd.f32 %v778_v39, %v1627_v28 }
 0x51c   : > { %v1651_v43 = vmul.f32 0.70710677, %v781_v40 }
 0x51d   : > { %v1649_v42 = vmul.f32 0.70710677, %v780_v41 }
 0x51f   : > { %1125 = vmatprep.mubr.msk.f32.mxu0 %vm448_vm1, %v1649_v42 }
 0x520   : > { %1126 = vmatmul.mubr.msk.f32.vlgmr.msra.gmra.mrb[2].mxu0 %vm448_vm1, %v1651_v43 }
 0x5f3   : > { %v1127_v44 = vpop.f32.mrb[2].mxu0 }
 0x5f4   : > { %v877_v45 = vsel %vm283_vm0, %v1127_v44, 0.0  ;;  %v887_v46 = vmul.f32 %v1127_v44, %v1127_v44  ;;  %v861_v47 = vpop.f32.mrb[3].mxu0 }
 0x5f5   : > { %v878_v48 = vrot.slane %v877_v45, 4  ;;  %v870_v31 = vsel %vm283_vm0, %v861_v47, 0.0  ;;  %v886_v49 = vmul.f32 %v861_v47, %v861_v47 }
 0x5f6   : > { %v895_v28 = vsel %vm283_vm0, %v887_v46, 0.0  ;;  %v871_v50 = vrot.slane %v870_v31, 4 }
 0x5f7   : > { %v879_v51 = vadd.f32 %v878_v48, %v877_v45  ;;  %v896_v53 = vrot.slane %v895_v28, 4  ;;  %v888_v55 = vsel %vm283_vm0, %v886_v49, 0.0 }
 0x5f8   : > { %v872_v56 = vadd.f32 %v871_v50, %v870_v31  ;;  %v889_v57 = vrot.slane %v888_v55, 4 }
 0x5f9   : > { %v880_v58 = vrot.slane %v879_v51, 2  ;;  %v897_v59 = vadd.f32 %v896_v53, %v895_v28 }
 0x5fa   : > { %v873_v60 = vrot.slane %v872_v56, 2  ;;  %v890_v61 = vadd.f32 %v889_v57, %v888_v55 }
 0x5fb   : > { %v881_v62 = vadd.f32 %v880_v58, %v879_v51  ;;  %v898_v63 = vrot.slane %v897_v59, 2 }
 0x5fc   : > { %v874_v0 = vadd.f32 %v873_v60, %v872_v56  ;;  %v891_v1 = vrot.slane %v890_v61, 2 }
 0x5fd   : > { %v882_v2 = vrot.slane %v881_v62, 1  ;;  %v899_v3 = vadd.f32 %v898_v63, %v897_v59 }
 0x5fe   : > { %v875_v4 = vrot.slane %v874_v0, 1  ;;  %v892_v5 = vadd.f32 %v891_v1, %v890_v61 }
 0x5ff   : > { %v883_v6 = vadd.f32 %v882_v2, %v881_v62  ;;  %v900_v7 = vrot.slane %v899_v3, 1 }
 0x600   : > { %v876_v8 = vadd.f32 %v875_v4, %v874_v0  ;;  %v893_v9 = vrot.slane %v892_v5, 1 }
 0x601   : > { %v885_v10 = vmul.f32 0.125, %v883_v6  ;;  %v901_v11 = vadd.f32 %v900_v7, %v899_v3 }
 0x602   : > { %v884_v12 = vmul.f32 0.125, %v876_v8  ;;  %v894_v13 = vadd.f32 %v893_v9, %v892_v5 }
 0x603   : > { %v903_v14 = vmul.f32 0.125, %v901_v11  ;;  %v905_v16 = vmul.f32 %v885_v10, %v885_v10  ;;  %v909_v25 = vsub.f32 %v1127_v44, %v885_v10 }
 0x604   : > { %v902_v18 = vmul.f32 0.125, %v894_v13  ;;  %v904_v19 = vmul.f32 %v884_v12, %v884_v12  ;;  %v908_v29 = vsub.f32 %v861_v47, %v884_v12 }
 0x605   : > { %v907_v20 = vsub.f32 %v903_v14, %v905_v16 }
 0x606   : > { %v906_v21 = vsub.f32 %v902_v18, %v904_v19 }
 0x607   : > { %v911_v22 = vadd.f32 1e-05, %v907_v20 }
 0x608   : > { %v910_v23 = vadd.f32 1e-05, %v906_v21 }
 0x609   : > { %1247 = vrsqrt.f32 %v911_v22 }
 0x60a   : > { %1249 = vrsqrt.f32 %v910_v23 }
 0x613   : > { %v1248_v27 = vpop.eup %1247 }
 0x614   : > { %v1250_v30 = vpop.eup %1249  ;;  %v915_v32 = vmul.f32 %v1248_v27, %v909_v25 }
 0x615   : > { %v914_v34 = vmul.f32 %v1250_v30, %v908_v29 }
 0x616   : > { %v921_v35 = vmul.f32 %v919_v26, %v915_v32 }
 0x617   : > { %v920_v15 = vmul.f32 %v919_v26, %v914_v34 }
 0x618   : > { %v927_v36 = vadd.f32 %v925_v33, %v921_v35 }
 0x619   : > { %v926_v37 = vadd.f32 %v925_v33, %v920_v15 }
 0x61a   : > { %v1074_v38 = vmul.f32 -1.442695, %v927_v36 }
 0x61b   : > { %v1073_v17 = vmul.f32 -1.442695, %v926_v37 }
 0x61c   : > { %1251 = vpow2.f32 %v1074_v38 }
 0x61d   : > { %1253 = vpow2.f32 %v1073_v17 }
 0x626   : > { %v1252_v39 = vpop.eup %1251 }
 0x627   : > { %v1254_v40 = vpop.eup %1253  ;;  %v935_v41 = vadd.f32 1.0, %v1252_v39 }
 0x628   : > { %v934_v52 = vadd.f32 1.0, %v1254_v40 }
 0x629   : > { %1255 = vrcp.f32 %v935_v41 }
 0x62a   : > { %1257 = vrcp.f32 %v934_v52 }
 0x633   : > { %v1256_v44 = vpop.eup %1255 }
 0x634   : > { %v1258_v45 = vpop.eup %1257  ;;  %944 = vrot.lane.b32.xlu1 %v1256_v44, %s1390_s25 }
 0x635   : > { %942 = vrot.lane.b32.xlu0 %v1258_v45, %s1390_s25 }
 0x6a6   : > { %v945_v54 = vpop.permute.xlu1 %944 }
 0x6a7   : > { %v949_v46 = vmul.f32 %v945_v54, %v927_v36  ;;  %v943_v47 = vpop.permute.xlu0 %942 }
 0x6a8   : > { %v948_v48 = vmul.f32 %v943_v47, %v926_v37 }
 0x6a9   : > { %v951_v31 = vadd.f32 %v949_v46, %v1651_v43 }
 0x6aa   : > { %v950_v49 = vadd.f32 %v948_v48, %v1649_v42 }
 0x6ab   : > { %v953_v50 = vmul.f32 0.70710677, %v951_v31 }
 0x6ac   : > { %v952_v28 = vmul.f32 0.70710677, %v950_v49 }
 0x6ad   : > { %955 = vst.msk [vmem:[%s274_s6 + $0x8] sm:$0xff] %vm448_vm1, %v953_v50 }
 0x6ae   : > { %954 = vst.msk [vmem:[%s274_s6] sm:$0xff] %vm448_vm1, %v952_v28 }
 0x6af PF: > { %p16_p6 = scmp.ge.s32.totalorder %s1523_s12, 4   ;;  %s1708_s18 = smov %s1375_s19 }
 0x6b0   : > { %s1709_s19 = smov %s1379_s20  ;;  %s1710_s20 = smov %s1534_s17 }
 0x6b1   : > { %s1711_s21 = smov %s1523_s12  ;;  %18 = sbr.rel (!%p16_p6) target bundleno = 4 (0x4), region = 92 }
 0x6b8   :  { %978 = vsyncpa [#allocation3], 1 }
 0x6b9   :  { %980 = vsyncpa [#allocation3 + $0x1], 1 }
 0x6ba   :  { %981 = vsyncpa [#allocation5], 1 }

</bundles_post_ra>
